<compile_context>
chip_gen: v6e
topology: v6e:2x2x1
jax: 0.10.0
libtpu: 0.0.40
codegen_flags: <defaults>
</compile_context>

<pallas_src>
import jax
import jax.numpy as jnp
from jax.experimental import pallas as pl
from jax.experimental.pallas import tpu as pltpu


# ----------------------------------------------------------------------------- kernels
def _bernoulli_kernel_lane_dense(xs_ref, mask_ref, logits_ref, out_ref):
    # xs_ref:     (M, D)        native dtype
    # mask_ref:   (M, 1)        f32 (1.0 = keep, 0.0 = nan-masked)
    # logits_ref: (S_TILE, M, D) native dtype
    # out_ref:    (M, S_TILE)   f32  (sample axis on lanes -> dense stores)
    x = xs_ref[...].astype(jnp.float32)
    w = 1.0 - 2.0 * x                                        # (M, D); x in {0,1}
    t = w[None, :, :] * logits_ref[...].astype(jnp.float32)  # (S_TILE, M, D)
    # log Bernoulli(logits=z).prob(x) = -softplus((1-2x)*z), stable form.
    lp = -(jnp.maximum(t, 0.0) + jnp.log1p(jnp.exp(-jnp.abs(t))))
    red = jnp.sum(lp, axis=-1)                               # (S_TILE, M)
    out_ref[...] = red.T * mask_ref[...]                     # (M, S_TILE)


def _bernoulli_kernel_plain(xs_ref, mask_ref, logits_ref, out_ref):
    # Fallback layout: out last dim = modalities (same as original kernel).
    # xs_ref: (M, D), mask_ref: (1, M), logits_ref: (S_TILE, M, D), out_ref: (S_TILE, M)
    x = xs_ref[...].astype(jnp.float32)
    w = 1.0 - 2.0 * x
    t = w[None, :, :] * logits_ref[...].astype(jnp.float32)
    lp = -(jnp.maximum(t, 0.0) + jnp.log1p(jnp.exp(-jnp.abs(t))))
    out_ref[...] = jnp.sum(lp, axis=-1) * mask_ref[...]


# ----------------------------------------------------------------------------- sizing
def _vmem_capacity_bytes():
    try:
        return int(pltpu.get_tpu_info().vmem_capacity_bytes)
    except Exception:
        return 64 * 1024 * 1024  # conservative (v7x per-core VMEM)


def _choose_s_tile(S, M, D, in_itemsize, vmem_cap):
    """Largest sample tile whose working set fits comfortably in VMEM."""
    budget = max(vmem_cap // 4, 8 * 1024 * 1024)
    # per sample-row: double-buffered native logits + ~2 f32 temporaries + output
    row_bytes = M * D * (2 * in_itemsize + 8) + 8 * M
    max_rows = max(1, budget // row_bytes)
    if S <= max_rows:
        return S
    # out block's minor dim must be a multiple of 128 (or equal to S)
    return min(S, max(128, (max_rows // 128) * 128))


# ----------------------------------------------------------------------------- wrapper
def bernoulli_likelihood_forward(xs, like_params, nan_mask=None):
    """Pallas equivalent of BernoulliLikelihood.forward.

    xs:          [batch, modalities, m_dim]
    like_params: tuple of length 1; like_params[0]: [batch, n_samples, modalities, m_dim]
    nan_mask:    optional bool [batch, modalities]
    returns:     [batch, n_samples, modalities] (float32)
    """
    assert len(like_params) == 1, (
        f"BernoulliLikelihood only takes a single parameter. Found {len(like_params)}."
    )
    logits = like_params[0]
    assert logits.ndim == 4, f"len({logits.shape}) != 4"
    B, S, M, D = logits.shape
    assert xs.shape == (B, M, D), f"{xs.shape} != {(B, M, D)}"

    if nan_mask is None:
        keep = jnp.ones((B, M), dtype=jnp.float32)
    else:
        keep = (~nan_mask).astype(jnp.float32)

    vmem_cap = _vmem_capacity_bytes()
    s_tile = _choose_s_tile(S, M, D, logits.dtype.itemsize, vmem_cap)
    grid = (B, pl.cdiv(S, s_tile))

    cost = pl.CostEstimate(
        flops=6 * B * S * M * D,
        transcendentals=2 * B * S * M * D,
        bytes_accessed=int(
            logits.size * logits.dtype.itemsize
            + xs.size * xs.dtype.itemsize
            + B * S * M * 4
            + B * M * 4
        ),
    )
    cparams = pltpu.CompilerParams(
        dimension_semantics=("parallel", "parallel"),
        vmem_limit_bytes=min(int(0.7 * vmem_cap), 96 * 1024 * 1024),
    )

    def run(lane_dense):
        if lane_dense:
            mask_arr = keep.reshape(B, M, 1)
            out_shape = jax.ShapeDtypeStruct((B, M, S), jnp.float32)
            out_spec = pl.BlockSpec((None, M, s_tile), lambda b, s: (b, 0, s))
            mask_spec = pl.BlockSpec((None, M, 1), lambda b, s: (b, 0, 0))
            kernel = _bernoulli_kernel_lane_dense
        else:
            mask_arr = keep.reshape(B, 1, M)
            out_shape = jax.ShapeDtypeStruct((B, S, M), jnp.float32)
            out_spec = pl.BlockSpec((None, s_tile, M), lambda b, s: (b, s, 0))
            mask_spec = pl.BlockSpec((None, 1, M), lambda b, s: (b, 0, 0))
            kernel = _bernoulli_kernel_plain

        out = pl.pallas_call(
            kernel,
            out_shape=out_shape,
            grid_spec=pltpu.PrefetchScalarGridSpec(
                num_scalar_prefetch=0,
                grid=grid,
                in_specs=[
                    # xs / mask block indices are constant along the s axis ->
                    # they stay VMEM-resident, no re-DMA per sample tile.
                    pl.BlockSpec((None, M, D), lambda b, s: (b, 0, 0)),
                    mask_spec,
                    pl.BlockSpec((None, s_tile, M, D), lambda b, s: (b, s, 0, 0)),
                ],
                out_specs=out_spec,
            ),
            compiler_params=cparams,
            cost_estimate=cost,
        )(xs, mask_arr, logits)

        if lane_dense:
            out = jnp.swapaxes(out, 1, 2)  # (B, M, S) -> (B, S, M); output is D-x smaller
        return out

    try:
        return run(lane_dense=True)
    except Exception:
        # Fallback if the minor-dim transpose does not lower on this toolchain.
        return run(lane_dense=False)


# ----------------------------------------------------------------------------- reference
def _reference(xs, logits, nan_mask=None):
    # Pure-JAX reference matching the PyTorch semantics (general BCE-with-logits form).
    x = xs[:, None, :, :].astype(jnp.float32)
    z = logits.astype(jnp.float32)
    lp = x * z - (jnp.maximum(z, 0.0) + jnp.log1p(jnp.exp(-jnp.abs(z))))
    lp = lp.sum(axis=3)
    if nan_mask is not None:
        lp = lp * (~nan_mask).astype(jnp.float32)[:, None, :]
    return lp


if __name__ == "__main__":
    key = jax.random.PRNGKey(0)
    k_x, k_z, k_m = jax.random.split(key, 3)

    batch, n_samples, modalities, m_dim = 2, 8, 4, 32

    xs = jax.random.bernoulli(k_x, p=0.5, shape=(batch, modalities, m_dim)).astype(
        jnp.float32
    )
    logits = jax.random.normal(
        k_z, (batch, n_samples, modalities, m_dim), dtype=jnp.float32
    )
    nan_mask = jax.random.bernoulli(k_m, p=0.25, shape=(batch, modalities))

    # f32 path with nan mask
    out = jax.block_until_ready(
        bernoulli_likelihood_forward(xs, (logits,), nan_mask=nan_mask)
    )
    ref = _reference(xs, logits, nan_mask=nan_mask)
    assert out.shape == (batch, n_samples, modalities)
    assert jnp.allclose(out, ref, atol=1e-5, rtol=1e-5)

    # f32 path without mask
    out2 = jax.block_until_ready(bernoulli_likelihood_forward(xs, (logits,)))
    ref2 = _reference(xs, logits, None)
    assert jnp.allclose(out2, ref2, atol=1e-5, rtol=1e-5)

    # bf16 logits stay bf16 in HBM (half the DMA traffic); kernel upcasts internally.
    logits_bf16 = logits.astype(jnp.bfloat16)
    out3 = jax.block_until_ready(
        bernoulli_likelihood_forward(xs, (logits_bf16,), nan_mask=nan_mask)
    )
    ref3 = _reference(xs, logits_bf16.astype(jnp.float32), nan_mask=nan_mask)
    assert jnp.allclose(out3, ref3, atol=1e-4, rtol=1e-4)

    print("KERNEL_OK")
</pallas_src>

<mosaic_0001>
module attributes {stable_mosaic.version = 11 : i64} {
  func.func @_bernoulli_kernel_lane_dense(%arg0: i32, %arg1: i32, %arg2: memref<1x4x32xf32, #tpu.memory_space<vmem>>, %arg3: memref<1x4x1xf32, #tpu.memory_space<vmem>>, %arg4: memref<1x8x4x32xf32, #tpu.memory_space<vmem>>, %arg5: memref<1x4x8xf32, #tpu.memory_space<vmem>>) attributes {dimension_semantics = [#tpu.dimension_semantics<parallel>, #tpu.dimension_semantics<parallel>], iteration_bounds = array<i64: 2, 1>, scalar_prefetch = 0 : i64, scratch_operands = 0 : i64, tpu.core_type = #tpu.core_type<tc>, window_params = [{transform_indices = @transform_0, window_bounds = array<i64: 1, 4, 32>}, {transform_indices = @transform_1, window_bounds = array<i64: 1, 4, 1>}, {transform_indices = @transform_2, window_bounds = array<i64: 1, 8, 4, 32>}, {transform_indices = @transform_3, window_bounds = array<i64: 1, 4, 8>}]} {
    %c0 = arith.constant 0 : index
    %c0_0 = arith.constant 0 : index
    %c0_1 = arith.constant 0 : index
    %0 = vector.load %arg2[%c0, %c0_0, %c0_1] : memref<1x4x32xf32, #tpu.memory_space<vmem>>, vector<1x4x32xf32>
    %1 = vector.shape_cast %0 : vector<1x4x32xf32> to vector<4x32xf32>
    %cst = arith.constant 2.000000e+00 : f32
    %2 = vector.broadcast %cst : f32 to vector<4x32xf32>
    %3 = arith.mulf %2, %1 : vector<4x32xf32>
    %cst_2 = arith.constant 1.000000e+00 : f32
    %4 = vector.broadcast %cst_2 : f32 to vector<4x32xf32>
    %5 = arith.subf %4, %3 : vector<4x32xf32>
    %6 = vector.shape_cast %5 : vector<4x32xf32> to vector<1x4x32xf32>
    %c0_3 = arith.constant 0 : index
    %c0_4 = arith.constant 0 : index
    %c0_5 = arith.constant 0 : index
    %c0_6 = arith.constant 0 : index
    %7 = vector.load %arg4[%c0_3, %c0_4, %c0_5, %c0_6] : memref<1x8x4x32xf32, #tpu.memory_space<vmem>>, vector<1x8x4x32xf32>
    %8 = vector.shape_cast %7 : vector<1x8x4x32xf32> to vector<8x4x32xf32>
    %9 = vector.broadcast %6 : vector<1x4x32xf32> to vector<8x4x32xf32>
    %10 = arith.mulf %9, %8 : vector<8x4x32xf32>
    %cst_7 = arith.constant 0.000000e+00 : f32
    %11 = vector.broadcast %cst_7 : f32 to vector<8x4x32xf32>
    %12 = arith.maximumf %10, %11 : vector<8x4x32xf32>
    %13 = math.absf %10 : vector<8x4x32xf32>
    %cst_8 = arith.constant 0.000000e+00 : f32
    %14 = vector.broadcast %cst_8 : f32 to vector<8x4x32xf32>
    %15 = arith.subf %14, %13 : vector<8x4x32xf32>
    %16 = math.exp %15 : vector<8x4x32xf32>
    %17 = math.log1p %16 : vector<8x4x32xf32>
    %18 = arith.addf %12, %17 : vector<8x4x32xf32>
    %cst_9 = arith.constant 0.000000e+00 : f32
    %19 = vector.broadcast %cst_9 : f32 to vector<8x4x32xf32>
    %20 = arith.subf %19, %18 : vector<8x4x32xf32>
    %cst_10 = arith.constant dense<0.000000e+00> : vector<8x4xf32>
    %21 = vector.multi_reduction <add>, %20, %cst_10 [2] : vector<8x4x32xf32> to vector<8x4xf32>
    %22 = tpu.transpose %21, [1, 0] : vector<8x4xf32> -> vector<4x8xf32>
    %c0_11 = arith.constant 0 : index
    %c0_12 = arith.constant 0 : index
    %c0_13 = arith.constant 0 : index
    %23 = vector.load %arg3[%c0_11, %c0_12, %c0_13] : memref<1x4x1xf32, #tpu.memory_space<vmem>>, vector<1x4x1xf32>
    %24 = vector.shape_cast %23 : vector<1x4x1xf32> to vector<4x1xf32>
    %25 = vector.broadcast %24 : vector<4x1xf32> to vector<4x8xf32>
    %26 = arith.mulf %22, %25 : vector<4x8xf32>
    %c0_14 = arith.constant 0 : index
    %c0_15 = arith.constant 0 : index
    %c0_16 = arith.constant 0 : index
    %27 = vector.load %arg5[%c0_14, %c0_15, %c0_16] : memref<1x4x8xf32, #tpu.memory_space<vmem>>, vector<1x4x8xf32>
    %28 = vector.shape_cast %27 : vector<1x4x8xf32> to vector<4x8xf32>
    %29 = vector.shape_cast %26 : vector<4x8xf32> to vector<1x4x8xf32>
    tpu.vector_store %arg5[%c0_14, %c0_15, %c0_16], %29 {strides = array<i32>} : memref<1x4x8xf32, #tpu.memory_space<vmem>>, vector<1x4x8xf32>,
    return
  }
  func.func @transform_0(%arg0: i32, %arg1: i32) -> (i32, i32, i32) {
    %c0_i32 = arith.constant 0 : i32
    %c0_i32_0 = arith.constant 0 : i32
    %c0_i32_1 = arith.constant 0 : i32
    return %arg0, %c0_i32, %c0_i32_0 : i32, i32, i32
  }
  func.func @transform_1(%arg0: i32, %arg1: i32) -> (i32, i32, i32) {
    %c0_i32 = arith.constant 0 : i32
    %c0_i32_0 = arith.constant 0 : i32
    %c0_i32_1 = arith.constant 0 : i32
    return %arg0, %c0_i32, %c0_i32_0 : i32, i32, i32
  }
  func.func @transform_2(%arg0: i32, %arg1: i32) -> (i32, i32, i32, i32) {
    %c0_i32 = arith.constant 0 : i32
    %c0_i32_0 = arith.constant 0 : i32
    %c0_i32_1 = arith.constant 0 : i32
    return %arg0, %arg1, %c0_i32, %c0_i32_0 : i32, i32, i32, i32
  }
  func.func @transform_3(%arg0: i32, %arg1: i32) -> (i32, i32, i32) {
    %c0_i32 = arith.constant 0 : i32
    %c0_i32_0 = arith.constant 0 : i32
    return %arg0, %c0_i32, %arg1 : i32, i32, i32
  }
}

module attributes {stable_mosaic.version = 11 : i64} {
  func.func @_bernoulli_kernel_plain(%arg0: i32, %arg1: i32, %arg2: memref<1x4x32xf32, #tpu.memory_space<vmem>>, %arg3: memref<1x1x4xf32, #tpu.memory_space<vmem>>, %arg4: memref<1x8x4x32xf32, #tpu.memory_space<vmem>>, %arg5: memref<1x8x4xf32, #tpu.memory_space<vmem>>) attributes {dimension_semantics = [#tpu.dimension_semantics<parallel>, #tpu.dimension_semantics<parallel>], iteration_bounds = array<i64: 2, 1>, scalar_prefetch = 0 : i64, scratch_operands = 0 : i64, tpu.core_type = #tpu.core_type<tc>, window_params = [{transform_indices = @transform_0, window_bounds = array<i64: 1, 4, 32>}, {transform_indices = @transform_1, window_bounds = array<i64: 1, 1, 4>}, {transform_indices = @transform_2, window_bounds = array<i64: 1, 8, 4, 32>}, {transform_indices = @transform_3, window_bounds = array<i64: 1, 8, 4>}]} {
    %c0 = arith.constant 0 : index
    %c0_0 = arith.constant 0 : index
    %c0_1 = arith.constant 0 : index
    %0 = vector.load %arg2[%c0, %c0_0, %c0_1] : memref<1x4x32xf32, #tpu.memory_space<vmem>>, vector<1x4x32xf32>
    %1 = vector.shape_cast %0 : vector<1x4x32xf32> to vector<4x32xf32>
    %cst = arith.constant 2.000000e+00 : f32
    %2 = vector.broadcast %cst : f32 to vector<4x32xf32>
    %3 = arith.mulf %2, %1 : vector<4x32xf32>
    %cst_2 = arith.constant 1.000000e+00 : f32
    %4 = vector.broadcast %cst_2 : f32 to vector<4x32xf32>
    %5 = arith.subf %4, %3 : vector<4x32xf32>
    %6 = vector.shape_cast %5 : vector<4x32xf32> to vector<1x4x32xf32>
    %c0_3 = arith.constant 0 : index
    %c0_4 = arith.constant 0 : index
    %c0_5 = arith.constant 0 : index
    %c0_6 = arith.constant 0 : index
    %7 = vector.load %arg4[%c0_3, %c0_4, %c0_5, %c0_6] : memref<1x8x4x32xf32, #tpu.memory_space<vmem>>, vector<1x8x4x32xf32>
    %8 = vector.shape_cast %7 : vector<1x8x4x32xf32> to vector<8x4x32xf32>
    %9 = vector.broadcast %6 : vector<1x4x32xf32> to vector<8x4x32xf32>
    %10 = arith.mulf %9, %8 : vector<8x4x32xf32>
    %cst_7 = arith.constant 0.000000e+00 : f32
    %11 = vector.broadcast %cst_7 : f32 to vector<8x4x32xf32>
    %12 = arith.maximumf %10, %11 : vector<8x4x32xf32>
    %13 = math.absf %10 : vector<8x4x32xf32>
    %cst_8 = arith.constant 0.000000e+00 : f32
    %14 = vector.broadcast %cst_8 : f32 to vector<8x4x32xf32>
    %15 = arith.subf %14, %13 : vector<8x4x32xf32>
    %16 = math.exp %15 : vector<8x4x32xf32>
    %17 = math.log1p %16 : vector<8x4x32xf32>
    %18 = arith.addf %12, %17 : vector<8x4x32xf32>
    %cst_9 = arith.constant 0.000000e+00 : f32
    %19 = vector.broadcast %cst_9 : f32 to vector<8x4x32xf32>
    %20 = arith.subf %19, %18 : vector<8x4x32xf32>
    %cst_10 = arith.constant dense<0.000000e+00> : vector<8x4xf32>
    %21 = vector.multi_reduction <add>, %20, %cst_10 [2] : vector<8x4x32xf32> to vector<8x4xf32>
    %c0_11 = arith.constant 0 : index
    %c0_12 = arith.constant 0 : index
    %c0_13 = arith.constant 0 : index
    %22 = vector.load %arg3[%c0_11, %c0_12, %c0_13] : memref<1x1x4xf32, #tpu.memory_space<vmem>>, vector<1x1x4xf32>
    %23 = vector.shape_cast %22 : vector<1x1x4xf32> to vector<1x4xf32>
    %24 = vector.broadcast %23 : vector<1x4xf32> to vector<8x4xf32>
    %25 = arith.mulf %21, %24 : vector<8x4xf32>
    %c0_14 = arith.constant 0 : index
    %c0_15 = arith.constant 0 : index
    %c0_16 = arith.constant 0 : index
    %26 = vector.load %arg5[%c0_14, %c0_15, %c0_16] : memref<1x8x4xf32, #tpu.memory_space<vmem>>, vector<1x8x4xf32>
    %27 = vector.shape_cast %26 : vector<1x8x4xf32> to vector<8x4xf32>
    %28 = vector.shape_cast %25 : vector<8x4xf32> to vector<1x8x4xf32>
    tpu.vector_store %arg5[%c0_14, %c0_15, %c0_16], %28 {strides = array<i32>} : memref<1x8x4xf32, #tpu.memory_space<vmem>>, vector<1x8x4xf32>,
    return
  }
  func.func @transform_0(%arg0: i32, %arg1: i32) -> (i32, i32, i32) {
    %c0_i32 = arith.constant 0 : i32
    %c0_i32_0 = arith.constant 0 : i32
    %c0_i32_1 = arith.constant 0 : i32
    return %arg0, %c0_i32, %c0_i32_0 : i32, i32, i32
  }
  func.func @transform_1(%arg0: i32, %arg1: i32) -> (i32, i32, i32) {
    %c0_i32 = arith.constant 0 : i32
    %c0_i32_0 = arith.constant 0 : i32
    %c0_i32_1 = arith.constant 0 : i32
    return %arg0, %c0_i32, %c0_i32_0 : i32, i32, i32
  }
  func.func @transform_2(%arg0: i32, %arg1: i32) -> (i32, i32, i32, i32) {
    %c0_i32 = arith.constant 0 : i32
    %c0_i32_0 = arith.constant 0 : i32
    %c0_i32_1 = arith.constant 0 : i32
    return %arg0, %arg1, %c0_i32, %c0_i32_0 : i32, i32, i32, i32
  }
  func.func @transform_3(%arg0: i32, %arg1: i32) -> (i32, i32, i32) {
    %c0_i32 = arith.constant 0 : i32
    %c0_i32_0 = arith.constant 0 : i32
    return %arg0, %arg1, %c0_i32 : i32, i32, i32
  }
}

</mosaic_0001>

<bundles_post_ra>
// kernel: tpu_custom_call.1
= control target key start
LH: loop header
LB: loop body
LE: loop exit
PB: predicated region body
PF: predicated region fallthrough
CT: control target
= control target key end

     0   :  { %8 = vsyncpa [#allocation3], 0  ;;  %s1140_s0 = inlined_call_operand.vmem [shape: f32[2,4,32], index: 0, kind: input, shape index: {}]   ;;  %s1141_s1 = inlined_call_operand.vmem [shape: f32[2,4,1], index: 1, kind: input, shape index: {}]   ;;  %s1142_s2 = inlined_call_operand.hbm [shape: f32[2,8,4,32], index: 2, kind: input, shape index: {}]   ;;  %s1143_s3 = inlined_call_operand.hbm [shape: f32[2,4,8], index: 3, kind: output, shape index: {}]  }
   0x1   :  { %10 = vsyncpa [#allocation3 + $0x1], 0 }
   0x2   :  { %11 = vsyncpa [#allocation4], 0 }
   0x3   :  { %13 = vsyncpa [#allocation4 + $0x1], 0  ;;  %s884_s12 = smov 0   ;;  %s886_s13 = smov 0  }
   0x4   :  { %s888_s14 = smov 0   ;;  %s890_s15 = smov 0  }
   0x5   :  { %s892_s16 = smov 0   ;;  %s894_s17 = smov 0  }
   0x6 LB: > { %s633_s18 = sadd.s32 4294967295, %s857_s17   ;;  %s634_s19 = sadd.s32 4294967294, %s857_s17   ;;  %s857_s17 = sphi %s894_s17, %s19_s17   ;;  %s853_s16 = sphi %s892_s16, %s1168_s16   ;;  %s849_s15 = sphi %s890_s15, %s1167_s15   ;;  %s845_s14 = sphi %s888_s14, %s1166_s14   ;;  %s841_s13 = sphi %s886_s13, %s1165_s13   ;;  %s837_s12 = sphi %s884_s12, %s1164_s12  }
   0x7   : > { %s31_s20 = sadd.s32 1, %s853_s16  ;;  %s92_s21 = sadd.s32 1, %s845_s14 }
   0x8   : > { %p33_p0 = scmp.ge.s32.totalorder %s31_s20, 2  ;;  %p99_p1 = scmp.ne.s32.totalorder %s845_s14, %s841_s13 }
   0x9   : > { %p100_p2 = scmp.eq.s32.totalorder %s857_s17, 0  ;;  %p105_p3 = scmp.ne.s32.totalorder %s841_s13, %s837_s12 }
   0xa   : > { %s1170_s20 = smov (%p33_p0, %s31_s20), 0  ;;  %p106_p5 = scmp.eq.s32.totalorder %s633_s18, 0 }
   0xb   : > { %p925_p4 = por %p100_p2, %p99_p1  ;;  %s87_s23 = ssub.s32 %s853_s16, %s1170_s20 }
   0xc   : > { %p131_p6 = scmp.eq.s32.totalorder %s633_s18, 1  ;;  %p90_p7 = scmp.eq.s32.totalorder %s87_s23, 0 }
   0xd   : > { %p931_p8 = por %p106_p5, %p105_p3  ;;  %p137_p10 = scmp.eq.s32.totalorder %s634_s19, 1 }
   0xe   : > { %p935_p9 = por %p131_p6, %p99_p1  ;;  %p662_p13 = scmp.lt.s32.totalorder %s857_s17, 2 }
   0xf   : > { %s940_s26 = scalar_select %p90_p7, %s845_s14, %s92_s21  }
  0x10   : > { %p942_p11 = por %p137_p10, %p105_p3  ;;  %s171_s28 = sand.u32 1, %s845_s14  }
  0x11   : > { %s637_s29 = sshll.u32 %s171_s28, 5  ;;  %s649_s30 = sshll.u32 %s853_s16, 9 }
  0x12   : > { %s183_s6 = scalar_lea.hbm %s1142_s2, %s649_s30  ;;  %s175_s7 = scalar_lea.vmem [#allocation2], %s637_s29 }
  0x13   : > { %s184_s8 = sshll.u32 %s175_s7, 4  ;;  %p955_p0 = pnand %p662_p13, %p925_p4  ;;  %s185_s8 = int_to_ptr.vmem [resolvable:$true] %s184_s8 }
  0x14   : > { %p640_p1 = scmp.ge.s32.totalorder %s857_s17, 1  ;;  %s172_s10 = scalar_lea.sflag [#allocation3], %s171_s28 }
  0x15   : > { %p751_p2 = pneg %p955_p0  ;;  %s762_s11 = scalar_lea.vmem %s185_s8, 512 }
  0x16   : > { %p763_p3 = scmp.ne.s32.totalorder %s185_s8, %s762_s11  ;;  %s859_s18 = smov [#allocation2]  }
  0x17   : > { %s767_s19 = sshll.u32 %s859_s18, 4  ;;  %s768_s19 = int_to_ptr.vmem [resolvable:$false] %s767_s19 }
  0x18   : > { %p765_p5 = pnand %p763_p3, %p751_p2  ;;  %s769_s21 = scalar_lea.vmem %s768_s19, 1024 }
  0x19   : > { %p770_p7 = scmp.lt.s32.totalorder %s185_s8, %s768_s19  ;;  %p771_p10 = scmp.lt.s32.totalorder %s769_s21, %s762_s11 }
  0x1a   : > { %p766_p6 = pneg %p765_p5 }
  0x1b   : > { %p772_p12 = por %p771_p10, %p770_p7 }
  0x1d   : > { %p773_p4 = pnand %p772_p12, %p766_p6 }
  0x1f   : > { %776 = shalt.err (!%p773_p4)
}
  0x20   : > { %s860_s22 = smov 64   ;;  %s861_s23 = smov 4  }
  0x21   : > { %657 = dma.hbm_to_vmem [thread:$0]  (!%p955_p0), %s183_s6, 512, %s185_s8, %s172_s10, %s860_s22, %s860_s22, %s861_s23  }
  0x22   : > { %p192_p13 = scmp.lt.s32.totalorder %s857_s17, 3 }
  0x24   : > { %p193_p2 = pnand %p640_p1, %p192_p13 }
  0x25   : > { %s968_s28 = sand.u32 (!%p193_p2), 1, %s841_s13  }
  0x26   : > { %196 = sbr.rel (%p193_p2) target bundleno = 395 (0x18b), region = 32  ;;  %s641_s29 = sshll.u32 (!%p193_p2), %s968_s28, 5 }
  0x27   : > { %s199_s30 = scalar_lea.sflag (!%p193_p2), [#allocation3], %s968_s28  ;;  %s202_s4 = scalar_lea.vmem (!%p193_p2), [#allocation2], %s641_s29 }
  0x2b   : > { %828 = dma.done.wait (%p931_p8), %s199_s30, 512  }
  0x2c   : > { %830 = vsyncadd (%p931_p8), %s199_s30, 4294966784  ;;  %p233_p12 = scmp.lt.s32.totalorder %s849_s15, 1  ;;  %v245_v2 = vld [vmem:[%s202_s4] sm:$0xf]  ;;  %v247_v3 = vld [vmem:[%s202_s4 + $0x8] sm:$0xf] }
  0x2d   : > { %v246_v4 = vld [vmem:[%s202_s4 + $0x4] sm:$0xf]  ;;  %v248_v5 = vld [vmem:[%s202_s4 + $0xc] sm:$0xf]  ;;  %v249_v7 = vld [vmem:[%s202_s4 + $0x10] sm:$0xf] }
  0x2e   : > { %s978_s5 = scalar_select %p233_p12, %s849_s15, 1  ;;  %v250_v8 = vld [vmem:[%s202_s4 + $0x14] sm:$0xf]  ;;  %v251_v13 = vld [vmem:[%s202_s4 + $0x18] sm:$0xf]  ;;  %vm389_vm0 = vcmask 257024  }
  0x2f   : > { %v252_v16 = vld [vmem:[%s202_s4 + $0x1c] sm:$0xf]  ;;  %vm456_vm9 = vcmask 1041409   ;;  %vm458_vm10 = vcmask 1042434   ;;  %vm460_vm11 = vcmask 1043459   ;;  %vm462_vm12 = vcmask 1044484  }
  0x30   : > { %s643_s6 = sshll.u32 %s978_s5, 2  ;;  %vm464_vm13 = vcmask 1045509   ;;  %vm466_vm14 = vcmask 1046534   ;;  %vm468_vm15 = vcmask 1047559   ;;  %s642_s18 = sshll.u32 %s968_s28, 2 }
  0x31   : > { %s236_s9 = scalar_lea.vmem %s1140_s0, %s643_s6  ;;  %s240_s11 = scalar_lea.vmem %s1141_s1, %s643_s6 }
  0x32   : > { %v242_v0 = vld [vmem:[%s236_s9] sm:$0xf]  ;;  %s646_s19 = sshll.u32 %s849_s15, 6  ;;  %s232_s21 = scalar_lea.vmem [#allocation5], %s642_s18 }
  0x33   : > { %v243_v1 = vmul.f32 2.0, %v242_v0  ;;  %s527_s22 = sshll.u32 %s232_s21, 4  ;;  %s525_s30 = scalar_lea.hbm %s1143_s3, %s646_s19  ;;  %s528_s22 = int_to_ptr.vmem [resolvable:$true] %s527_s22 }
  0x34   : > { %s513_s4 = scalar_lea.sflag [#allocation4], %s968_s28  ;;  %s777_s5 = scalar_lea.vmem %s528_s22, 64 }
  0x35   : > { %v244_v6 = vsub.f32 1.0, %v243_v1  ;;  %p778_p8 = scmp.ne.s32.totalorder %s528_s22, %s777_s5  ;;  %s863_s6 = smov [#allocation5]  }
  0x36   : > { %s781_s7 = sshll.u32 %s863_s6, 4  ;;  %s782_s7 = int_to_ptr.vmem [resolvable:$false] %s781_s7 }
  0x37   : > { %v986_v9 = vmul.f32 %v245_v2, %v244_v6  ;;  %v988_v10 = vmul.f32 %v247_v3, %v244_v6  ;;  %v990_v11 = vmul.f32 %v246_v4, %v244_v6  ;;  %v992_v12 = vmul.f32 %v248_v5, %v244_v6  ;;  %p779_p0 = pnand %p778_p8, %p935_p9  ;;  %s783_s15 = scalar_lea.vmem %s782_s7, 128 }
  0x38   : > { %v994_v14 = vmul.f32 %v249_v7, %v244_v6  ;;  %v996_v15 = vmul.f32 %v250_v8, %v244_v6  ;;  %v1002_v21 = vmul.f32 %v251_v13, %v244_v6  ;;  %v1005_v25 = vmul.f32 %v252_v16, %v244_v6  ;;  %p784_p3 = scmp.lt.s32.totalorder %s528_s22, %s782_s7  ;;  %p785_p5 = scmp.lt.s32.totalorder %s783_s15, %s777_s5 }
  0x39   : > { %v269_v17 = vand.u32 2147483647, %v986_v9  ;;  %v271_v18 = vand.u32 2147483647, %v988_v10  ;;  %v270_v19 = vand.u32 2147483647, %v990_v11  ;;  %p780_p1 = pneg %p779_p0 }
  0x3a   : > { %v272_v20 = vand.u32 2147483647, %v992_v12  ;;  %v273_v24 = vand.u32 2147483647, %v994_v14  ;;  %v274_v28 = vand.u32 2147483647, %v996_v15  ;;  %p786_p6 = por %p785_p5, %p784_p3 }
  0x3b   : > { %v277_v22 = vsub.f32 0.0, %v269_v17  ;;  %v279_v23 = vsub.f32 0.0, %v271_v18  ;;  %v278_v26 = vsub.f32 0.0, %v270_v19  ;;  %v275_v36 = vand.u32 2147483647, %v1002_v21 }
  0x3c   : > { %v280_v27 = vsub.f32 0.0, %v272_v20  ;;  %v281_v31 = vsub.f32 0.0, %v273_v24  ;;  %v282_v34 = vsub.f32 0.0, %v274_v28  ;;  %v276_v37 = vand.u32 2147483647, %v1005_v25  ;;  %p787_p7 = pnand %p786_p6, %p780_p1 }
  0x3d   : > { %v285_v29 = vmul.f32 1.442695, %v277_v22  ;;  %v289_v30 = vmul.f32 1.442695, %v279_v23  ;;  %v287_v32 = vmul.f32 1.442695, %v278_v26 }
  0x3e   : > { %v291_v33 = vmul.f32 1.442695, %v280_v27  ;;  %v293_v35 = vmul.f32 1.442695, %v281_v31  ;;  %v295_v38 = vmul.f32 1.442695, %v282_v34 }
  0x3f   : > { %717 = vpow2.f32 %v285_v29  ;;  %v283_v39 = vsub.f32 0.0, %v275_v36  ;;  %v284_v40 = vsub.f32 0.0, %v276_v37  ;;  %v261_v56 = vmax.f32 %v986_v9, 0.0 }
  0x40   : > { %719 = vpow2.f32 %v289_v30  ;;  %v263_v57 = vmax.f32 %v988_v10, 0.0  ;;  %v262_v60 = vmax.f32 %v990_v11, 0.0  ;;  %v264_v63 = vmax.f32 %v992_v12, 0.0 }
  0x41   : > { %721 = vpow2.f32 %v287_v32  ;;  %v297_v41 = vmul.f32 1.442695, %v283_v39  ;;  %v299_v42 = vmul.f32 1.442695, %v284_v40  ;;  %v265_v1 = vmax.f32 %v994_v14, 0.0 }
  0x42   : > { %723 = vpow2.f32 %v291_v33  ;;  %v266_v13 = vmax.f32 %v996_v15, 0.0  ;;  %v267_v23 = vmax.f32 %v1002_v21, 0.0  ;;  %v862_v21 = vmov 0  }
  0x43   : > { %725 = vpow2.f32 %v293_v35  ;;  %716 = vset.pattern.permute.xlu0 %v862_v21  ;;  %v422_v33 = vlaneseq }
  0x44   : > { %727 = vpow2.f32 %v295_v38 }
  0x45   : > { %729 = vpow2.f32 %v297_v41  ;;  %v423_v34 = vand.u32 127, %v422_v33 }
  0x46   : > { %731 = vpow2.f32 %v299_v42 }
  0x4c   : > { %v718_v43 = vpop.eup %717 }
  0x4d   : > { %v720_v44 = vpop.eup %719  ;;  %v301_v45 = vadd.f32 1.0, %v718_v43  ;;  %v304_v54 = vmul.f32 -0.5, %v718_v43  ;;  %v307_v4 = vand.u32 2147483647, %v718_v43 }
  0x4e   : > { %v722_v46 = vpop.eup %721  ;;  %v319_v47 = vadd.f32 1.0, %v720_v44  ;;  %v322_v58 = vmul.f32 -0.5, %v720_v44  ;;  %v325_v7 = vand.u32 2147483647, %v720_v44 }
  0x4f   : > { %v724_v48 = vpop.eup %723  ;;  %733 = vlog2.f32 %v301_v45  ;;  %v310_v49 = vadd.f32 1.0, %v722_v46  ;;  %v313_v61 = vmul.f32 -0.5, %v722_v46  ;;  %v305_v3 = vadd.f32 1.0, %v304_v54 }
  0x50   : > { %v726_v50 = vpop.eup %725  ;;  %735 = vlog2.f32 %v319_v47  ;;  %v328_v51 = vadd.f32 1.0, %v724_v48  ;;  %v331_v0 = vmul.f32 -0.5, %v724_v48  ;;  %v323_v6 = vadd.f32 1.0, %v322_v58 }
  0x51   : > { %737 = vlog2.f32 %v310_v49  ;;  %v1010_v52 = vpop.eup %727  ;;  %v337_v55 = vadd.f32 1.0, %v726_v50  ;;  %v340_v5 = vmul.f32 -0.5, %v726_v50  ;;  %v314_v9 = vadd.f32 1.0, %v313_v61 }
  0x52   : > { %v1012_v53 = vpop.eup %729  ;;  %739 = vlog2.f32 %v328_v51  ;;  %v346_v62 = vadd.f32 1.0, %v1010_v52  ;;  %v316_v10 = vand.u32 2147483647, %v722_v46  ;;  %v334_v11 = vand.u32 2147483647, %v724_v48 }
  0x53   : > { %v1016_v59 = vpop.eup %731  ;;  %741 = vlog2.f32 %v337_v55  ;;  %v355_v2 = vadd.f32 1.0, %v1012_v53  ;;  %v332_v16 = vadd.f32 1.0, %v331_v0  ;;  %v343_v17 = vand.u32 2147483647, %v726_v50 }
  0x54   : > { %743 = vlog2.f32 %v346_v62  ;;  %v364_v8 = vadd.f32 1.0, %v1016_v59  ;;  %v349_v18 = vmul.f32 -0.5, %v1010_v52  ;;  %v306_v19 = vmul.f32 %v718_v43, %v305_v3 }
  0x55   : > { %745 = vlog2.f32 %v355_v2  ;;  %vm1026_vm1 = vcmp.lt.f32.partialorder %v307_v4, 0.0004427343  ;;  %v341_v22 = vadd.f32 1.0, %v340_v5  ;;  %v324_v26 = vmul.f32 %v720_v44, %v323_v6 }
  0x56   : > { %747 = vlog2.f32 %v364_v8  ;;  %vm1031_vm2 = vcmp.lt.f32.partialorder %v325_v7, 0.0004427343  ;;  %v352_v28 = vand.u32 2147483647, %v1010_v52  ;;  %v358_v29 = vmul.f32 -0.5, %v1012_v53 }
  0x57   : > { %v315_v32 = vmul.f32 %v722_v46, %v314_v9  ;;  %vm1037_vm3 = vcmp.lt.f32.partialorder %v316_v10, 0.0004427343  ;;  %vm1041_vm4 = vcmp.lt.f32.partialorder %v334_v11, 0.0004427343  ;;  %v333_v37 = vmul.f32 %v724_v48, %v332_v16 }
  0x58   : > { %vm1045_vm5 = vcmp.lt.f32.partialorder %v343_v17, 0.0004427343  ;;  %v350_v39 = vadd.f32 1.0, %v349_v18  ;;  %v342_v42 = vmul.f32 %v726_v50, %v341_v22  ;;  %v367_v43 = vmul.f32 -0.5, %v1016_v59 }
  0x59   : > { %vm1054_vm6 = vcmp.lt.f32.partialorder %v352_v28, 0.0004427343  ;;  %v359_v48 = vadd.f32 1.0, %v358_v29  ;;  %v361_v55 = vand.u32 2147483647, %v1012_v53 }
  0x5a   : > { %v370_v62 = vand.u32 2147483647, %v1016_v59  ;;  %v368_v4 = vadd.f32 1.0, %v367_v43 }
  0x5b   : > { %v360_v8 = vmul.f32 %v1012_v53, %v359_v48  ;;  %vm1072_vm7 = vcmp.lt.f32.partialorder %v361_v55, 0.0004427343 }
  0x5c   : > { %v734_v24 = vpop.eup %733  ;;  %v369_v20 = vmul.f32 %v1016_v59, %v368_v4  ;;  %vm371_vm8 = vcmp.lt.f32.partialorder %v370_v62, 0.0004427343 }
  0x5d   : > { %v736_v30 = vpop.eup %735  ;;  %v303_v31 = vmul.f32 0.6931472, %v734_v24 }
  0x5e   : > { %v738_v35 = vpop.eup %737  ;;  %v321_v36 = vmul.f32 0.6931472, %v736_v30 }
  0x5f   : > { %v309_v40 = vsel %vm1026_vm1, %v306_v19, %v303_v31  ;;  %v312_v41 = vmul.f32 0.6931472, %v738_v35  ;;  %v740_v44 = vpop.eup %739  ;;  %v268_v19 = vmax.f32 %v1005_v25, 0.0  ;;  %v425_v35 = vshrl.u32 %v422_v33, 7 }
  0x60   : > { %v373_v45 = vadd.f32 %v309_v40, %v261_v56  ;;  %v327_v46 = vsel %vm1031_vm2, %v324_v26, %v321_v36  ;;  %v330_v54 = vmul.f32 0.6931472, %v740_v44  ;;  %v742_v50 = vpop.eup %741  ;;  %v351_v56 = vmul.f32 %v1010_v52, %v350_v39 }
  0x61   : > { %v375_v49 = vadd.f32 %v327_v46, %v263_v57  ;;  %v318_v51 = vsel %vm1037_vm3, %v315_v32, %v312_v41  ;;  %v339_v3 = vmul.f32 0.6931472, %v742_v50  ;;  %v744_v57 = vpop.eup %743 }
  0x62   : > { %v381_v58 = vsub.f32 0.0, %v373_v45  ;;  %v374_v61 = vadd.f32 %v318_v51, %v262_v60  ;;  %v336_v2 = vsel %vm1041_vm4, %v333_v37, %v330_v54  ;;  %v746_v60 = vpop.eup %745  ;;  %v348_v10 = vmul.f32 0.6931472, %v744_v57 }
  0x63   : > { %v383_v0 = vsub.f32 0.0, %v375_v49  ;;  %v376_v7 = vadd.f32 %v336_v2, %v264_v63  ;;  %v345_v9 = vsel %vm1045_vm5, %v342_v42, %v339_v3  ;;  %v357_v53 = vmul.f32 0.6931472, %v746_v60  ;;  %v748_v63 = vpop.eup %747 }
  0x64   : > { %v390_v5 = vsel %vm389_vm0, %v381_v58, 0.0  ;;  %v382_v6 = vsub.f32 0.0, %v374_v61  ;;  %v377_v12 = vadd.f32 %v345_v9, %v265_v1  ;;  %v354_v18 = vsel %vm1054_vm6, %v351_v56, %v348_v10 }
  0x65   : > { %391 = vadd.xlane.f32.xlu0 %v390_v5  ;;  %v396_v52 = vsel %vm389_vm0, %v383_v0, 0.0  ;;  %v384_v17 = vsub.f32 0.0, %v376_v7  ;;  %v378_v26 = vadd.f32 %v354_v18, %v266_v13  ;;  %v363_v14 = vsel %vm1072_vm7, %v360_v8, %v357_v53 }
  0x66   : > { %397 = vadd.xlane.f32.xlu1 %v396_v52  ;;  %v393_v16 = vsel %vm389_vm0, %v382_v6, 0.0  ;;  %v385_v24 = vsub.f32 0.0, %v377_v12  ;;  %v379_v1 = vadd.f32 %v363_v14, %v267_v23  ;;  %v366_v27 = vmul.f32 0.6931472, %v748_v63  ;;  %v503_v23 = vld [vmem:[%s240_s11] sm:$0xf] }
  0x67   : > { %v399_v22 = vsel %vm389_vm0, %v384_v17, 0.0  ;;  %v386_v59 = vsub.f32 0.0, %v378_v26  ;;  %v426_v37 = vsub.s32 %v423_v34, %v425_v35 }
  0x68   : > { %v402_v25 = vsel %vm389_vm0, %v385_v24, 0.0  ;;  %v387_v28 = vsub.f32 0.0, %v379_v1  ;;  %v372_v29 = vsel %vm371_vm8, %v369_v20, %v366_v27 }
  0x69   : > { %394 = vadd.xlane.f32.xlu0 %v393_v16  ;;  %v405_v30 = vsel %vm389_vm0, %v386_v59, 0.0  ;;  %v380_v31 = vadd.f32 %v372_v29, %v268_v19 }
  0x6a   : > { %400 = vadd.xlane.f32.xlu1 %v399_v22  ;;  %v408_v15 = vsel %vm389_vm0, %v387_v28, 0.0 }
  0x6b   : > { %v388_v13 = vsub.f32 0.0, %v380_v31 }
  0x6d   : > { %403 = vadd.xlane.f32.xlu0 %v402_v25  ;;  %v411_v32 = vsel %vm389_vm0, %v388_v13, 0.0  ;;  %vm510_vm0 = vcmask 60416  }
  0x6e   : > { %406 = vadd.xlane.f32.xlu1 %v405_v30 }
  0x71   : > { %409 = vadd.xlane.f32.xlu0 %v408_v15 }
  0x72   : > { %412 = vadd.xlane.f32.xlu1 %v411_v32 }
  0x87   : > { %506 = vperm.xlu0 %716, %v503_v23  }
  0xee   : > { %v392_v36 = vpop.xlane.xlu0 %391 }
  0xef   : > { %v398_v38 = vpop.xlane.xlu1 %397  ;;  %v427_v40 = vrot.slane %v392_v36, %v426_v37 }
  0xf0   : > { %v435_v43 = vrot.slane %v398_v38, %v426_v37 }
  0xf2   : > { %v395_v39 = vpop.xlane.xlu0 %394 }
  0xf3   : > { %v431_v41 = vrot.slane %v395_v39, %v426_v37  ;;  %v401_v42 = vpop.xlane.xlu1 %400 }
  0xf4   : > { %v439_v44 = vrot.slane %v401_v42, %v426_v37 }
  0xf5   : > { %v457_v45 = vsel %vm456_vm9, %v431_v41, %v427_v40 }
  0xf6   : > { %v459_v46 = vsel %vm458_vm10, %v435_v43, %v457_v45  ;;  %v404_v47 = vpop.xlane.xlu0 %403 }
  0xf7   : > { %v461_v48 = vsel %vm460_vm11, %v439_v44, %v459_v46  ;;  %v443_v49 = vrot.slane %v404_v47, %v426_v37  ;;  %v407_v51 = vpop.xlane.xlu1 %406 }
  0xf8   : > { %v447_v54 = vrot.slane %v407_v51, %v426_v37 }
  0xf9   : > { %v463_v55 = vsel %vm462_vm12, %v443_v49, %v461_v48 }
  0xfa   : > { %v410_v50 = vpop.xlane.xlu0 %409  ;;  %v465_v62 = vsel %vm464_vm13, %v447_v54, %v463_v55 }
  0xfb   : > { %v451_v58 = vrot.slane %v410_v50, %v426_v37  ;;  %v413_v61 = vpop.xlane.xlu1 %412 }
  0xfc   : > { %v455_v56 = vrot.slane %v413_v61, %v426_v37 }
  0xfd   : > { %v467_v0 = vsel %vm466_vm14, %v451_v58, %v465_v62 }
  0xfe   : > { %v469_v2 = vsel %vm468_vm15, %v455_v56, %v467_v0 }
  0xff   : > { %471 = vxpose.xlu1.b32.start.end [1/1] (short) (narrow) %v469_v2, 8 }
 0x102   : > { %v507_v3 = vpop.permute.xlu0 %506 }
 0x17b   : > { %v487_v4 = vpop.trf.xlu1 }
 0x17c   : > { %v509_v57 = vmul.f32 %v507_v3, %v487_v4 }
 0x17e   : > { %511 = vst.msk [vmem:[%s232_s21] sm:$0xf] %vm510_vm0, %v509_v57 }
 0x17f   : > { %790 = shalt.err (!%p787_p7)
}
 0x180   : > { %s791_s8 = scalar_lea.hbm %s525_s30, 64  ;;  %s795_s24 = scalar_lea.hbm %s1143_s3, 128 }
 0x181   : > { %p792_p10 = scmp.ne.s32.totalorder %s525_s30, %s791_s8  ;;  %p796_p2 = scmp.lt.s32.totalorder %s525_s30, %s1143_s3 }
 0x182   : > { %p797_p12 = scmp.lt.s32.totalorder %s795_s24, %s791_s8 }
 0x183   : > { %p793_p4 = pnand %p792_p10, %p935_p9 }
 0x184   : > { %p798_p8 = por %p797_p12, %p796_p2 }
 0x185   : > { %p794_p13 = pneg %p793_p4 }
 0x187   : > { %p799_p0 = pnand %p798_p8, %p794_p13 }
 0x189   : > { %802 = shalt.err (!%p799_p0)
}
 0x18a   : > { %652 = dma.vmem_to_hbm [thread:$0]  (%p935_p9), %s528_s22, 64, %s525_s30, %s513_s4  }
 0x18b PF: > { %s539_s18 = sand.u32 1, %s837_s12   ;;  %p1163_p1 = scmp.ge.s32.totalorder %s857_s17, 2 }
 0x18c   : > { %s540_s19 = scalar_lea.sflag [#allocation4], %s539_s18 }
 0x18d   : > { %p659_p3 = pnand %p1163_p1, %p942_p11 }
 0x18f   : > { %p660_p5 = pneg %p659_p3 }
 0x191   : > { %832 = dma.done.wait (%p660_p5), %s540_s19, 64  }
 0x192   : > { %834 = vsyncadd (%p660_p5), %s540_s19, 4294967232  ;;  %s19_s17 = sadd.s32 1, %s857_s17   ;;  %s1164_s12 = smov %s841_s13 }
 0x193   : > { %p16_p6 = scmp.ge.s32.totalorder %s19_s17, 4   ;;  %s1165_s13 = smov %s845_s14 }
 0x194   : > { %s1166_s14 = smov %s940_s26  ;;  %s1167_s15 = smov %s853_s16 }
 0x195   : > { %s1168_s16 = smov %s1170_s20  ;;  %18 = sbr.rel (!%p16_p6) target bundleno = 6 (0x6), region = 83 }
 0x19a   :  { %545 = vsyncpa [#allocation3], 1 }
 0x19b   :  { %547 = vsyncpa [#allocation3 + $0x1], 1 }
 0x19c   :  { %548 = vsyncpa [#allocation4], 1 }
 0x19d   :  { %550 = vsyncpa [#allocation4 + $0x1], 1 }

// kernel: tpu_custom_call.1
= control target key start
LH: loop header
LB: loop body
LE: loop exit
PB: predicated region body
PF: predicated region fallthrough
CT: control target
= control target key end

     0   :  { %8 = vsyncpa [#allocation3], 0  ;;  %s1219_s0 = inlined_call_operand.hbm [shape: f32[2,4,32], index: 0, kind: input, shape index: {}]   ;;  %s1220_s1 = inlined_call_operand.hbm [shape: f32[2,1,4], index: 1, kind: input, shape index: {}]   ;;  %s1221_s2 = inlined_call_operand.hbm [shape: f32[2,8,4,32], index: 2, kind: input, shape index: {}]   ;;  %s1222_s3 = inlined_call_operand.vmem [shape: f32[2,8,4], index: 3, kind: output, shape index: {}]  }
   0x1   :  { %10 = vsyncpa [#allocation3 + $0x1], 0 }
   0x2   :  { %11 = vsyncpa [#allocation5], 0 }
   0x3   :  { %13 = vsyncpa [#allocation5 + $0x1], 0  ;;  %s967_s12 = smov 0   ;;  %s969_s13 = smov 0  }
   0x4   :  { %s971_s14 = smov 0   ;;  %s973_s15 = smov 0  }
   0x5   :  { %s975_s16 = smov 0   ;;  %s977_s17 = smov 0  }
   0x6 LB: > { %s681_s18 = sadd.s32 4294967295, %s939_s17   ;;  %s31_s19 = sadd.s32 1, %s935_s16  ;;  %s939_s17 = sphi %s977_s17, %s19_s17   ;;  %s935_s16 = sphi %s975_s16, %s1244_s16   ;;  %s931_s15 = sphi %s973_s15, %s1243_s15   ;;  %s927_s14 = sphi %s971_s14, %s1242_s14   ;;  %s923_s13 = sphi %s969_s13, %s1241_s13   ;;  %s919_s12 = sphi %s967_s12, %s1240_s12  }
   0x7   : > { %p33_p0 = scmp.ge.s32.totalorder %s31_s19, 2  ;;  %s38_s20 = sadd.s32 1, %s927_s14 }
   0x8   : > { %p45_p1 = scmp.ne.s32.totalorder %s927_s14, %s923_s13  ;;  %p46_p2 = scmp.eq.s32.totalorder %s939_s17, 0 }
   0x9   : > { %s1246_s19 = smov (%p33_p0, %s31_s19), 0  ;;  %p51_p4 = scmp.ne.s32.totalorder %s923_s13, %s919_s12 }
   0xa   : > { %p47_p3 = por %p46_p2, %p45_p1  ;;  %s35_s21 = ssub.s32 %s935_s16, %s1246_s19 }
   0xb   : > { %p52_p5 = scmp.eq.s32.totalorder %s681_s18, 0  ;;  %p36_p6 = scmp.eq.s32.totalorder %s35_s21, 0 }
   0xc   : > { %p715_p8 = scmp.lt.s32.totalorder %s939_s17, 2  ;;  %s1017_s24 = sand.u32 1, %s927_s14  }
   0xd   : > { %p1008_p7 = por %p52_p5, %p51_p4  ;;  %s175_s26 = sand.u32 1, %s939_s17  }
   0xe   : > { %s1014_s23 = scalar_select %p36_p6, %s927_s14, %s38_s20  }
   0xf   : > { %p1019_p9 = pnand %p715_p8, %p47_p3  ;;  %s687_s27 = sshll.u32 %s935_s16, 4 }
  0x10   : > { %s178_s28 = scalar_lea.vmem [#allocation4], %s1017_s24  ;;  %s183_s5 = scalar_lea.hbm %s1220_s1, %s687_s27 }
  0x11   : > { %s185_s29 = sshll.u32 %s178_s28, 4  ;;  %s1029_s6 = scalar_lea.sflag [#allocation5], %s175_s26  ;;  %s186_s29 = int_to_ptr.vmem [resolvable:$true] %s185_s29 }
  0x12   : > { %p803_p10 = pneg %p1019_p9  ;;  %s814_s7 = scalar_lea.vmem %s186_s29, 16 }
  0x13   : > { %p815_p11 = scmp.ne.s32.totalorder %s186_s29, %s814_s7  ;;  %s941_s8 = smov [#allocation4]  }
  0x14   : > { %s819_s9 = sshll.u32 %s941_s8, 4  ;;  %s820_s9 = int_to_ptr.vmem [resolvable:$false] %s819_s9 }
  0x15   : > { %p817_p12 = pnand %p815_p11, %p803_p10  ;;  %s821_s10 = scalar_lea.vmem %s820_s9, 32 }
  0x16   : > { %p822_p0 = scmp.lt.s32.totalorder %s186_s29, %s820_s9  ;;  %p823_p1 = scmp.lt.s32.totalorder %s821_s10, %s814_s7 }
  0x17   : > { %p818_p13 = pneg %p817_p12 }
  0x18   : > { %p824_p2 = por %p823_p1, %p822_p0 }
  0x1a   : > { %p825_p3 = pnand %p824_p2, %p818_p13 }
  0x1c   : > { %828 = shalt.err (!%p825_p3)
}
  0x1d   : > { %711 = dma.hbm_to_vmem [thread:$0]  (!%p1019_p9), %s183_s5, 16, %s186_s29, %s1029_s6  }
  0x1e   : > { %s688_s11 = sshll.u32 %s1017_s24, 5  ;;  %p691_p4 = scmp.ge.s32.totalorder %s939_s17, 1 }
  0x1f   : > { %p213_p5 = scmp.lt.s32.totalorder %s939_s17, 3  ;;  %s685_s20 = sshll.u32 %s1017_s24, 2 }
  0x20   : > { %s686_s21 = sshll.u32 %s935_s16, 6  ;;  %s161_s30 = scalar_lea.vmem [#allocation2], %s685_s20 }
  0x21   : > { %p1042_p6 = pnand %p691_p4, %p213_p5  ;;  %s166_s28 = scalar_lea.hbm %s1219_s0, %s686_s21 }
  0x22   : > { %s168_s4 = sshll.u32 %s161_s30, 4  ;;  %s158_s7 = scalar_lea.sflag [#allocation3], %s1017_s24  ;;  %s169_s4 = int_to_ptr.vmem [resolvable:$true] %s168_s4 }
  0x23   : > { %s842_s8 = scalar_lea.vmem %s169_s4, 64  ;;  %s942_s29 = smov [#allocation2]  }
  0x24   : > { %p843_p8 = scmp.ne.s32.totalorder %s169_s4, %s842_s8  ;;  %s847_s5 = sshll.u32 %s942_s29, 4  ;;  %s848_s5 = int_to_ptr.vmem [resolvable:$false] %s847_s5 }
  0x25   : > { %s849_s9 = scalar_lea.vmem %s848_s5, 128  ;;  %p850_p13 = scmp.lt.s32.totalorder %s169_s4, %s848_s5 }
  0x26   : > { %p845_p11 = pnand %p843_p8, %p803_p10  ;;  %p851_p0 = scmp.lt.s32.totalorder %s849_s9, %s842_s8 }
  0x28   : > { %p846_p12 = pneg %p845_p11  ;;  %p852_p1 = por %p851_p0, %p850_p13 }
  0x2a   : > { %p853_p2 = pnand %p852_p1, %p846_p12 }
  0x2c   : > { %856 = shalt.err (!%p853_p2)
}
  0x2d   : > { %708 = dma.hbm_to_vmem [thread:$0]  (!%p1019_p9), %s166_s28, 64, %s169_s4, %s158_s7  }
  0x2e   : > { %s698_s24 = sshll.u32 %s935_s16, 9  ;;  %s196_s10 = scalar_lea.vmem [#allocation6], %s688_s11 }
  0x2f   : > { %s205_s20 = sshll.u32 %s196_s10, 4  ;;  %s204_s27 = scalar_lea.hbm %s1221_s2, %s698_s24  ;;  %s206_s20 = int_to_ptr.vmem [resolvable:$true] %s205_s20 }
  0x30   : > { %s870_s30 = scalar_lea.vmem %s206_s20, 512  ;;  %s943_s8 = smov [#allocation6]  }
  0x31   : > { %p871_p3 = scmp.ne.s32.totalorder %s206_s20, %s870_s30  ;;  %s875_s29 = sshll.u32 %s943_s8, 4  ;;  %s876_s29 = int_to_ptr.vmem [resolvable:$false] %s875_s29 }
  0x32   : > { %s877_s5 = scalar_lea.vmem %s876_s29, 1024  ;;  %p878_p8 = scmp.lt.s32.totalorder %s206_s20, %s876_s29 }
  0x33   : > { %p873_p4 = pnand %p871_p3, %p803_p10  ;;  %p879_p11 = scmp.lt.s32.totalorder %s877_s5, %s870_s30 }
  0x35   : > { %p874_p5 = pneg %p873_p4  ;;  %p880_p12 = por %p879_p11, %p878_p8 }
  0x37   : > { %p881_p13 = pnand %p880_p12, %p874_p5 }
  0x39   : > { %884 = shalt.err (!%p881_p13)
}
  0x3a   : > { %s944_s11 = smov 64   ;;  %s945_s28 = smov 4  }
  0x3b   : > { %714 = dma.hbm_to_vmem [thread:$0]  (!%p1019_p9), %s204_s27, 512, %s206_s20, %s1029_s6, %s944_s11, %s944_s11, %s945_s28  }
  0x3c   : > { %217 = sbr.rel (%p1042_p6) target bundleno = 424 (0x1a8), region = 32  ;;  %s1070_s4 = sand.u32 (!%p1042_p6), 1, %s923_s13  }
  0x3d   : > { %s692_s7 = sshll.u32 (!%p1042_p6), %s1070_s4, 2  ;;  %s220_s9 = scalar_lea.sflag (!%p1042_p6), [#allocation3], %s1070_s4 }
  0x3e   : > { %s223_s24 = scalar_lea.vmem (!%p1042_p6), [#allocation2], %s692_s7 }
  0x41   : > { %910 = dma.done.wait (%p1008_p7), %s220_s9, 64  }
  0x42   : > { %912 = vsyncadd (%p1008_p7), %s220_s9, 4294967232  ;;  %s228_s25 = sand.u32 1, %s681_s18   ;;  %s231_s12 = scalar_lea.vmem [#allocation4], %s1070_s4 }
  0x43   : > { %s229_s6 = scalar_lea.sflag [#allocation5], %s228_s25 }
  0x44   : > { %914 = dma.done.wait (%p1008_p7), %s229_s6, 528  }
  0x45   : > { %916 = vsyncadd (%p1008_p7), %s229_s6, 4294966768  ;;  %s693_s10 = sshll.u32 %s1070_s4, 5  ;;  %v282_v0 = vld [vmem:[%s223_s24] sm:$0xf]  ;;  %vm429_vm0 = vcmask 257024   ;;  %vm538_vm9 = vcmask 1041409  }
  0x46   : > { %v283_v1 = vmul.f32 2.0, %v282_v0  ;;  %s240_s20 = scalar_lea.vmem [#allocation6], %s693_s10  ;;  %p275_p7 = scmp.lt.s32.totalorder %s931_s15, 1  ;;  %vm540_vm10 = vcmask 1042434   ;;  %vm542_vm11 = vcmask 1043459   ;;  %vm544_vm12 = vcmask 1044484  }
  0x47   : > { %v285_v2 = vld [vmem:[%s240_s20] sm:$0xf]  ;;  %v287_v3 = vld [vmem:[%s240_s20 + $0x8] sm:$0xf]  ;;  %v286_v4 = vld [vmem:[%s240_s20 + $0x4] sm:$0xf] }
  0x48   : > { %v288_v5 = vld [vmem:[%s240_s20 + $0xc] sm:$0xf]  ;;  %v284_v6 = vsub.f32 1.0, %v283_v1  ;;  %v289_v7 = vld [vmem:[%s240_s20 + $0x10] sm:$0xf]  ;;  %s1248_s15 = smov (!%p275_p7, %s931_s15), 1 }
  0x49   : > { %v290_v8 = vld [vmem:[%s240_s20 + $0x14] sm:$0xf]  ;;  %v291_v13 = vld [vmem:[%s240_s20 + $0x18] sm:$0xf]  ;;  %v292_v16 = vld [vmem:[%s240_s20 + $0x1c] sm:$0xf] }
  0x4a   : > { %v1086_v9 = vmul.f32 %v285_v2, %v284_v6  ;;  %v1088_v10 = vmul.f32 %v287_v3, %v284_v6  ;;  %v1090_v11 = vmul.f32 %v286_v4, %v284_v6  ;;  %v1092_v12 = vmul.f32 %v288_v5, %v284_v6  ;;  %s694_s18 = sshll.u32 %s1248_s15, 3 }
  0x4b   : > { %v1094_v14 = vmul.f32 %v289_v7, %v284_v6  ;;  %v1096_v15 = vmul.f32 %v290_v8, %v284_v6  ;;  %v1102_v21 = vmul.f32 %v291_v13, %v284_v6  ;;  %v1105_v25 = vmul.f32 %v292_v16, %v284_v6  ;;  %s281_s26 = scalar_lea.vmem %s1222_s3, %s694_s18 }
  0x4c   : > { %v309_v17 = vand.u32 2147483647, %v1086_v9  ;;  %v311_v18 = vand.u32 2147483647, %v1088_v10  ;;  %v310_v19 = vand.u32 2147483647, %v1090_v11 }
  0x4d   : > { %v312_v20 = vand.u32 2147483647, %v1092_v12  ;;  %v313_v24 = vand.u32 2147483647, %v1094_v14  ;;  %v314_v28 = vand.u32 2147483647, %v1096_v15 }
  0x4e   : > { %v317_v22 = vsub.f32 0.0, %v309_v17  ;;  %v319_v23 = vsub.f32 0.0, %v311_v18  ;;  %v318_v26 = vsub.f32 0.0, %v310_v19  ;;  %v315_v36 = vand.u32 2147483647, %v1102_v21 }
  0x4f   : > { %v320_v27 = vsub.f32 0.0, %v312_v20  ;;  %v321_v31 = vsub.f32 0.0, %v313_v24  ;;  %v322_v34 = vsub.f32 0.0, %v314_v28  ;;  %v316_v37 = vand.u32 2147483647, %v1105_v25 }
  0x50   : > { %v325_v29 = vmul.f32 1.442695, %v317_v22  ;;  %v329_v30 = vmul.f32 1.442695, %v319_v23  ;;  %v327_v32 = vmul.f32 1.442695, %v318_v26 }
  0x51   : > { %v331_v33 = vmul.f32 1.442695, %v320_v27  ;;  %v333_v35 = vmul.f32 1.442695, %v321_v31  ;;  %v335_v38 = vmul.f32 1.442695, %v322_v34 }
  0x52   : > { %769 = vpow2.f32 %v325_v29  ;;  %v323_v39 = vsub.f32 0.0, %v315_v36  ;;  %v324_v40 = vsub.f32 0.0, %v316_v37  ;;  %v301_v56 = vmax.f32 %v1086_v9, 0.0 }
  0x53   : > { %771 = vpow2.f32 %v329_v30  ;;  %v303_v57 = vmax.f32 %v1088_v10, 0.0  ;;  %v302_v60 = vmax.f32 %v1090_v11, 0.0  ;;  %v304_v63 = vmax.f32 %v1092_v12, 0.0 }
  0x54   : > { %773 = vpow2.f32 %v327_v32  ;;  %v337_v41 = vmul.f32 1.442695, %v323_v39  ;;  %v339_v42 = vmul.f32 1.442695, %v324_v40  ;;  %v305_v1 = vmax.f32 %v1094_v14, 0.0 }
  0x55   : > { %775 = vpow2.f32 %v331_v33  ;;  %v306_v13 = vmax.f32 %v1096_v15, 0.0  ;;  %v307_v23 = vmax.f32 %v1102_v21, 0.0  ;;  %v946_v21 = vmov 0  }
  0x56   : > { %777 = vpow2.f32 %v333_v35  ;;  %768 = vset.pattern.permute.xlu0 %v946_v21  ;;  %767 = vset.pattern.permute.xlu1 %v946_v21  ;;  %vm546_vm13 = vcmask 1045509   ;;  %vm548_vm14 = vcmask 1046534   ;;  %vm550_vm15 = vcmask 1047559  }
  0x57   : > { %779 = vpow2.f32 %v335_v38 }
  0x58   : > { %781 = vpow2.f32 %v337_v41 }
  0x59   : > { %783 = vpow2.f32 %v339_v42 }
  0x5f   : > { %v770_v43 = vpop.eup %769 }
  0x60   : > { %v772_v44 = vpop.eup %771  ;;  %v341_v45 = vadd.f32 1.0, %v770_v43  ;;  %v344_v54 = vmul.f32 -0.5, %v770_v43  ;;  %v347_v4 = vand.u32 2147483647, %v770_v43 }
  0x61   : > { %v774_v46 = vpop.eup %773  ;;  %v359_v47 = vadd.f32 1.0, %v772_v44  ;;  %v362_v58 = vmul.f32 -0.5, %v772_v44  ;;  %v365_v7 = vand.u32 2147483647, %v772_v44 }
  0x62   : > { %v776_v48 = vpop.eup %775  ;;  %785 = vlog2.f32 %v341_v45  ;;  %v350_v49 = vadd.f32 1.0, %v774_v46  ;;  %v353_v61 = vmul.f32 -0.5, %v774_v46  ;;  %v345_v3 = vadd.f32 1.0, %v344_v54 }
  0x63   : > { %v778_v50 = vpop.eup %777  ;;  %787 = vlog2.f32 %v359_v47  ;;  %v368_v51 = vadd.f32 1.0, %v776_v48  ;;  %v371_v0 = vmul.f32 -0.5, %v776_v48  ;;  %v363_v6 = vadd.f32 1.0, %v362_v58 }
  0x64   : > { %789 = vlog2.f32 %v350_v49  ;;  %v1110_v52 = vpop.eup %779  ;;  %v377_v55 = vadd.f32 1.0, %v778_v50  ;;  %v380_v5 = vmul.f32 -0.5, %v778_v50  ;;  %v354_v9 = vadd.f32 1.0, %v353_v61 }
  0x65   : > { %v1112_v53 = vpop.eup %781  ;;  %791 = vlog2.f32 %v368_v51  ;;  %v386_v62 = vadd.f32 1.0, %v1110_v52  ;;  %v356_v10 = vand.u32 2147483647, %v774_v46  ;;  %v374_v11 = vand.u32 2147483647, %v776_v48 }
  0x66   : > { %v1116_v59 = vpop.eup %783  ;;  %793 = vlog2.f32 %v377_v55  ;;  %v395_v2 = vadd.f32 1.0, %v1112_v53  ;;  %v372_v16 = vadd.f32 1.0, %v371_v0  ;;  %v383_v17 = vand.u32 2147483647, %v778_v50 }
  0x67   : > { %795 = vlog2.f32 %v386_v62  ;;  %v404_v8 = vadd.f32 1.0, %v1116_v59  ;;  %v389_v18 = vmul.f32 -0.5, %v1110_v52  ;;  %v346_v19 = vmul.f32 %v770_v43, %v345_v3 }
  0x68   : > { %797 = vlog2.f32 %v395_v2  ;;  %vm1126_vm1 = vcmp.lt.f32.partialorder %v347_v4, 0.0004427343  ;;  %v381_v22 = vadd.f32 1.0, %v380_v5  ;;  %v364_v26 = vmul.f32 %v772_v44, %v363_v6 }
  0x69   : > { %799 = vlog2.f32 %v404_v8  ;;  %vm1131_vm2 = vcmp.lt.f32.partialorder %v365_v7, 0.0004427343  ;;  %v392_v28 = vand.u32 2147483647, %v1110_v52  ;;  %v398_v29 = vmul.f32 -0.5, %v1112_v53 }
  0x6a   : > { %v355_v32 = vmul.f32 %v774_v46, %v354_v9  ;;  %vm1137_vm3 = vcmp.lt.f32.partialorder %v356_v10, 0.0004427343  ;;  %vm1141_vm4 = vcmp.lt.f32.partialorder %v374_v11, 0.0004427343  ;;  %v373_v37 = vmul.f32 %v776_v48, %v372_v16 }
  0x6b   : > { %vm1145_vm5 = vcmp.lt.f32.partialorder %v383_v17, 0.0004427343  ;;  %v390_v39 = vadd.f32 1.0, %v389_v18  ;;  %v382_v42 = vmul.f32 %v778_v50, %v381_v22  ;;  %v407_v43 = vmul.f32 -0.5, %v1116_v59 }
  0x6c   : > { %vm1154_vm6 = vcmp.lt.f32.partialorder %v392_v28, 0.0004427343  ;;  %v399_v48 = vadd.f32 1.0, %v398_v29  ;;  %v401_v55 = vand.u32 2147483647, %v1112_v53 }
  0x6d   : > { %v410_v62 = vand.u32 2147483647, %v1116_v59  ;;  %v408_v4 = vadd.f32 1.0, %v407_v43 }
  0x6e   : > { %v400_v8 = vmul.f32 %v1112_v53, %v399_v48  ;;  %vm1172_vm7 = vcmp.lt.f32.partialorder %v401_v55, 0.0004427343 }
  0x6f   : > { %v786_v24 = vpop.eup %785  ;;  %v409_v20 = vmul.f32 %v1116_v59, %v408_v4  ;;  %vm411_vm8 = vcmp.lt.f32.partialorder %v410_v62, 0.0004427343 }
  0x70   : > { %v788_v30 = vpop.eup %787  ;;  %v343_v31 = vmul.f32 0.6931472, %v786_v24 }
  0x71   : > { %v790_v35 = vpop.eup %789  ;;  %v361_v36 = vmul.f32 0.6931472, %v788_v30 }
  0x72   : > { %v349_v40 = vsel %vm1126_vm1, %v346_v19, %v343_v31  ;;  %v352_v41 = vmul.f32 0.6931472, %v790_v35  ;;  %v792_v44 = vpop.eup %791  ;;  %v308_v19 = vmax.f32 %v1105_v25, 0.0 }
  0x73   : > { %v413_v45 = vadd.f32 %v349_v40, %v301_v56  ;;  %v367_v46 = vsel %vm1131_vm2, %v364_v26, %v361_v36  ;;  %v370_v54 = vmul.f32 0.6931472, %v792_v44  ;;  %v794_v50 = vpop.eup %793  ;;  %v391_v56 = vmul.f32 %v1110_v52, %v390_v39 }
  0x74   : > { %v415_v49 = vadd.f32 %v367_v46, %v303_v57  ;;  %v358_v51 = vsel %vm1137_vm3, %v355_v32, %v352_v41  ;;  %v379_v3 = vmul.f32 0.6931472, %v794_v50  ;;  %v796_v57 = vpop.eup %795 }
  0x75   : > { %v421_v58 = vsub.f32 0.0, %v413_v45  ;;  %v414_v61 = vadd.f32 %v358_v51, %v302_v60  ;;  %v376_v2 = vsel %vm1141_vm4, %v373_v37, %v370_v54  ;;  %v798_v60 = vpop.eup %797  ;;  %v388_v10 = vmul.f32 0.6931472, %v796_v57 }
  0x76   : > { %v423_v0 = vsub.f32 0.0, %v415_v49  ;;  %v416_v7 = vadd.f32 %v376_v2, %v304_v63  ;;  %v385_v9 = vsel %vm1145_vm5, %v382_v42, %v379_v3  ;;  %v397_v53 = vmul.f32 0.6931472, %v798_v60  ;;  %v800_v63 = vpop.eup %799 }
  0x77   : > { %v430_v5 = vsel %vm429_vm0, %v421_v58, 0.0  ;;  %v422_v6 = vsub.f32 0.0, %v414_v61  ;;  %v417_v12 = vadd.f32 %v385_v9, %v305_v1  ;;  %v394_v18 = vsel %vm1154_vm6, %v391_v56, %v388_v10 }
  0x78   : > { %431 = vadd.xlane.f32.xlu0 %v430_v5  ;;  %v436_v52 = vsel %vm429_vm0, %v423_v0, 0.0  ;;  %v424_v17 = vsub.f32 0.0, %v416_v7  ;;  %v418_v26 = vadd.f32 %v394_v18, %v306_v13  ;;  %v403_v14 = vsel %vm1172_vm7, %v400_v8, %v397_v53 }
  0x79   : > { %437 = vadd.xlane.f32.xlu1 %v436_v52  ;;  %v433_v16 = vsel %vm429_vm0, %v422_v6, 0.0  ;;  %v425_v24 = vsub.f32 0.0, %v417_v12  ;;  %v419_v1 = vadd.f32 %v403_v14, %v307_v23  ;;  %v406_v27 = vmul.f32 0.6931472, %v800_v63  ;;  %v695_v23 = vld [vmem:[%s231_s12] ss:$0 sm:$0xff] }
  0x7a   : > { %v439_v22 = vsel %vm429_vm0, %v424_v17, 0.0  ;;  %v426_v59 = vsub.f32 0.0, %v418_v26  ;;  %v504_v51 = vlaneseq }
  0x7b   : > { %v442_v25 = vsel %vm429_vm0, %v425_v24, 0.0  ;;  %v427_v28 = vsub.f32 0.0, %v419_v1  ;;  %v412_v29 = vsel %vm411_vm8, %v409_v20, %v406_v27 }
  0x7c   : > { %434 = vadd.xlane.f32.xlu0 %v433_v16  ;;  %v445_v30 = vsel %vm429_vm0, %v426_v59, 0.0  ;;  %v420_v31 = vadd.f32 %v412_v29, %v308_v19  ;;  %v505_v55 = vand.u32 127, %v504_v51  ;;  %v507_v50 = vshrl.u32 %v504_v51, 7 }
  0x7d   : > { %440 = vadd.xlane.f32.xlu1 %v439_v22  ;;  %v448_v15 = vsel %vm429_vm0, %v427_v28, 0.0 }
  0x7e   : > { %v428_v13 = vsub.f32 0.0, %v420_v31  ;;  %v508_v61 = vsub.s32 %v505_v55, %v507_v50 }
  0x80   : > { %443 = vadd.xlane.f32.xlu0 %v442_v25  ;;  %v451_v32 = vsel %vm429_vm0, %v428_v13, 0.0  ;;  %vm553_vm0 = vcmask 31744  }
  0x81   : > { %446 = vadd.xlane.f32.xlu1 %v445_v30 }
  0x84   : > { %449 = vadd.xlane.f32.xlu0 %v448_v15 }
  0x85   : > { %452 = vadd.xlane.f32.xlu1 %v451_v32 }
  0x9a   : > { %461 = vbcast.lane.b32.xlu0 %v695_v23, 256 }
 0x101   : > { %v432_v33 = vpop.xlane.xlu0 %431 }
 0x102   : > { %v438_v36 = vpop.xlane.xlu1 %437 }
 0x105   : > { %v435_v34 = vpop.xlane.xlu0 %434 }
 0x106   : > { %v441_v38 = vpop.xlane.xlu1 %440 }
 0x109   : > { %v444_v35 = vpop.xlane.xlu0 %443 }
 0x10a   : > { %v447_v45 = vpop.xlane.xlu1 %446 }
 0x10d   : > { %v450_v37 = vpop.xlane.xlu0 %449 }
 0x10e   : > { %v453_v48 = vpop.xlane.xlu1 %452 }
 0x111   : > { %v462_v39 = vpop.permute.xlu0 %461 }
 0x112   : > { %v467_v40 = vmul.f32 %v462_v39, %v441_v38  ;;  %v464_v41 = vmul.f32 %v462_v39, %v432_v33  ;;  %v470_v42 = vmul.f32 %v462_v39, %v450_v37  ;;  %v465_v43 = vmul.f32 %v462_v39, %v435_v34 }
 0x113   : > { %v466_v44 = vmul.f32 %v462_v39, %v438_v36  ;;  %v468_v46 = vmul.f32 %v462_v39, %v444_v35  ;;  %v469_v47 = vmul.f32 %v462_v39, %v447_v45  ;;  %v471_v49 = vmul.f32 %v462_v39, %v453_v48 }
 0x114   : > { %490 = vperm.xlu0 %768, %v467_v40   ;;  %481 = vperm.xlu1 %767, %v464_v41  }
 0x118   : > { %499 = vperm.xlu0 %768, %v470_v42   ;;  %484 = vperm.xlu1 %767, %v465_v43  }
 0x11c   : > { %487 = vperm.xlu1 %767, %v466_v44  }
 0x120   : > { %493 = vperm.xlu1 %767, %v468_v46  }
 0x124   : > { %496 = vperm.xlu1 %767, %v469_v47  }
 0x128   : > { %502 = vperm.xlu1 %767, %v471_v49  }
 0x18f   : > { %v482_v54 = vpop.permute.xlu1 %481  ;;  %v491_v2 = vpop.permute.xlu0 %490 }
 0x190   : > { %v509_v3 = vrot.slane %v482_v54, %v508_v61  ;;  %v521_v7 = vrot.slane %v491_v2, %v508_v61 }
 0x193   : > { %v485_v58 = vpop.permute.xlu1 %484  ;;  %v500_v60 = vpop.permute.xlu0 %499 }
 0x194   : > { %v513_v62 = vrot.slane %v485_v58, %v508_v61  ;;  %v533_v16 = vrot.slane %v500_v60, %v508_v61 }
 0x196   : > { %v539_v57 = vsel %vm538_vm9, %v513_v62, %v509_v3 }
 0x197   : > { %v488_v56 = vpop.permute.xlu1 %487 }
 0x198   : > { %v517_v0 = vrot.slane %v488_v56, %v508_v61 }
 0x19a   : > { %v541_v5 = vsel %vm540_vm10, %v517_v0, %v539_v57 }
 0x19b   : > { %v494_v4 = vpop.permute.xlu1 %493  ;;  %v543_v52 = vsel %vm542_vm11, %v521_v7, %v541_v5 }
 0x19c   : > { %v525_v6 = vrot.slane %v494_v4, %v508_v61 }
 0x19e   : > { %v545_v10 = vsel %vm544_vm12, %v525_v6, %v543_v52 }
 0x19f   : > { %v497_v8 = vpop.permute.xlu1 %496 }
 0x1a0   : > { %v529_v9 = vrot.slane %v497_v8, %v508_v61 }
 0x1a2   : > { %v547_v11 = vsel %vm546_vm13, %v529_v9, %v545_v10 }
 0x1a3   : > { %v503_v17 = vpop.permute.xlu1 %502  ;;  %v549_v53 = vsel %vm548_vm14, %v533_v16, %v547_v11 }
 0x1a4   : > { %v537_v12 = vrot.slane %v503_v17, %v508_v61 }
 0x1a6   : > { %v551_v63 = vsel %vm550_vm15, %v537_v12, %v549_v53 }
 0x1a7   : > { %554 = vst.msk [vmem:[%s281_s26] sm:$0xff] %vm553_vm0, %v551_v63 }
 0x1a8 PF: > { %s19_s17 = sadd.s32 1, %s939_s17   ;;  %s1240_s12 = smov %s923_s13 }
 0x1a9   : > { %p16_p9 = scmp.ge.s32.totalorder %s19_s17, 4   ;;  %s1241_s13 = smov %s927_s14 }
 0x1aa   : > { %s1242_s14 = smov %s1014_s23  ;;  %s1243_s15 = smov %s935_s16 }
 0x1ab   : > { %s1244_s16 = smov %s1246_s19  ;;  %18 = sbr.rel (!%p16_p9) target bundleno = 6 (0x6), region = 96 }
 0x1b0   :  { %580 = vsyncpa [#allocation3], 1 }
 0x1b1   :  { %582 = vsyncpa [#allocation3 + $0x1], 1 }
 0x1b2   :  { %583 = vsyncpa [#allocation5], 1 }
 0x1b3   :  { %585 = vsyncpa [#allocation5 + $0x1], 1 }

</bundles_post_ra>
